<compile_context>
chip_gen: v5e
topology: v5e:2x2
jax: 0.10.0
libtpu: 0.0.40
codegen_flags: <defaults>
</compile_context>

<pallas_src>
import functools

import jax
import jax.numpy as jnp
from jax import lax
from jax.experimental import pallas as pl
from jax.experimental.pallas import tpu as pltpu


def pooled_tower_kernel(tok_ref, wsc_ref, boosts_ref, emb_ref,
                        wpack_ref, small_ref, out_ref,
                        *, BT, L, V, D, H1, H2, O_pad, eps):
    tok = tok_ref[...]            # [BT, L] int32 (padded token ids)
    wsc = wsc_ref[...]            # [BT, L] f32   (mask / bag_len == mean weighting)

    # --- EmbeddingBag(sum) with per_sample_weights = boost[token] * 1/len ---
    # Weighted bag-count matrix M[b, v] = sum_l wsc[b,l] * 1[tok[b,l] == v],
    # accumulated in [BT, V] (no [BT, L, V] one-hot, no cross-sublane reduce).
    vid = lax.broadcasted_iota(jnp.int32, (BT, V), 1)                # [BT, V]
    M = jnp.zeros((BT, V), jnp.float32)
    for l in range(L):                                               # L is small & static
        hit = tok[:, l:l + 1] == vid                                 # [BT, V] compare
        M = M + jnp.where(hit, wsc[:, l:l + 1], 0.0)                 # select-accumulate
    # Fold boosts on the [BT, V] side: boost depends only on the token id, so
    # M[b,v] * boost[v] == sum_l wsc[b,l] * boost[tok[b,l]] * 1[tok==v].
    M = M * boosts_ref[...]                                          # [1, V] broadcast

    # Single MXU matmul for the whole pooled embedding:
    pooled = jnp.dot(M, emb_ref[...],
                     preferred_element_type=jnp.float32)             # [BT, D]

    # --- packed weight slab: rows [0:D]=w1, [D:D+H1]=w2, [D+H1:D+H1+H2]=wo ---
    wp = wpack_ref[...]                                              # [D+H1+H2, Hmax]
    w1 = wp[0:D, :H1]
    w2 = wp[D:D + H1, :H2]
    wo = wp[D + H1:D + H1 + H2, :O_pad]                              # lane-dense (zero-padded)

    # --- packed small params: rows are b1,g1,bt1,b2,g2,bt2,bo ---
    sp = small_ref[...]                                              # [8, Hmax]
    b1, g1, bt1 = sp[0:1, :H1], sp[1:2, :H1], sp[2:3, :H1]
    b2, g2, bt2 = sp[3:4, :H2], sp[4:5, :H2], sp[5:6, :H2]
    bo = sp[6:7, :O_pad]

    # --- HiddenLayer: Linear -> ReLU -> (dropout: eval no-op) -> LayerNorm ---
    def hidden(h, w, b, g, bt, n):
        h = jnp.dot(h, w, preferred_element_type=jnp.float32) + b
        h = jnp.maximum(h, 0.0)
        # TODO(synk): nn.Dropout is a no-op in eval mode; training would need
        # pltpu.prng_seed / pltpu.prng_random_bits.
        inv_n = 1.0 / n
        s1 = jnp.sum(h, axis=-1, keepdims=True)                      # one-pass stats:
        s2 = jnp.sum(h * h, axis=-1, keepdims=True)                  # both reductions overlap
        mu = s1 * inv_n
        var = s2 * inv_n - mu * mu
        h = (h - mu) * lax.rsqrt(var + eps)
        return h * g + bt

    h = hidden(pooled, w1, b1, g1, bt1, float(H1))
    h = hidden(h, w2, b2, g2, bt2, float(H2))

    # --- output Linear (lane-dense: O padded to 128 -> unmasked store) ---
    out_ref[...] = (jnp.dot(h, wo, preferred_element_type=jnp.float32) + bo)


def pooled_tower_forward(tok_ids, mask, bag_len, params):
    """tok_ids [B, L] int32, mask [B, L] f32, bag_len [B] int32."""
    B, L = tok_ids.shape
    V, D = params["emb"].shape
    H1 = params["w1"].shape[1]
    H2 = params["w2"].shape[1]
    O = params["wo"].shape[1]
    O_pad = ((O + 127) // 128) * 128          # lane-dense output width
    Hmax = max(H1, H2, O_pad)                 # packed-slab lane width
    BT = 8                                    # batch tile (sublane multiple)
    B_pad = ((B + BT - 1) // BT) * BT

    # mean weighting folded with the padding mask (padded slots -> exactly 0)
    inv_len = jnp.where(bag_len > 0,
                        1.0 / jnp.maximum(bag_len, 1).astype(jnp.float32),
                        0.0)                                          # [B]
    wscale = (mask * inv_len[:, None]).astype(jnp.float32)            # [B, L]

    tok_p = jnp.zeros((B_pad, L), jnp.int32).at[:B].set(tok_ids.astype(jnp.int32))
    wsc_p = jnp.zeros((B_pad, L), jnp.float32).at[:B].set(wscale)

    # boosts as a lane-dense [1, V] row (folded into M inside the kernel)
    boosts_row = jnp.asarray(params["boosts"], jnp.float32).reshape(1, V)

    def pad2(a):
        a = jnp.asarray(a, jnp.float32)
        return jnp.pad(a, ((0, 0), (0, Hmax - a.shape[1])))

    # one weight slab [D+H1+H2, Hmax]  (w1, w2, wo stacked; zero-padded lanes)
    wpack = jnp.concatenate([pad2(params["w1"]),
                             pad2(params["w2"]),
                             pad2(params["wo"])], axis=0)

    def row(p):
        v = jnp.asarray(p, jnp.float32).reshape(1, -1)
        return jnp.pad(v, ((0, 0), (0, Hmax - v.shape[1])))

    # one small-vector slab [8, Hmax]: b1,g1,bt1,b2,g2,bt2,bo,(unused)
    small = jnp.concatenate(
        [row(params["b1"]), row(params["g1"]), row(params["bt1"]),
         row(params["b2"]), row(params["g2"]), row(params["bt2"]),
         row(params["bo"]), jnp.zeros((1, Hmax), jnp.float32)], axis=0)

    kernel = functools.partial(pooled_tower_kernel, BT=BT, L=L, V=V, D=D,
                               H1=H1, H2=H2, O_pad=O_pad, eps=1e-5)

    out = pl.pallas_call(
        kernel,
        out_shape=jax.ShapeDtypeStruct((B_pad, O_pad), jnp.float32),
        grid_spec=pltpu.PrefetchScalarGridSpec(
            num_scalar_prefetch=0,
            grid=(B_pad // BT,),
            in_specs=[
                pl.BlockSpec((BT, L), lambda i: (i, 0)),              # tok
                pl.BlockSpec((BT, L), lambda i: (i, 0)),              # wscale
                pl.BlockSpec((1, V), lambda i: (0, 0)),               # boosts row
                pl.BlockSpec((V, D), lambda i: (0, 0)),               # emb table
                pl.BlockSpec((D + H1 + H2, Hmax), lambda i: (0, 0)),  # weight slab
                pl.BlockSpec((8, Hmax), lambda i: (0, 0)),            # small slab
            ],
            out_specs=pl.BlockSpec((BT, O_pad), lambda i: (i, 0)),
        ),
        compiler_params=pltpu.CompilerParams(
            dimension_semantics=("parallel",)),   # megacore split at prod B (v7x)
    )(tok_p, wsc_p, boosts_row,
      jnp.asarray(params["emb"], jnp.float32), wpack, small)

    return out[:B, :O]


def ref_forward(tokens_list, params):
    """Pure-JAX reference mirroring the PyTorch module (eval mode)."""
    D = params["emb"].shape[1]
    pooled_rows = []
    for toks in tokens_list:
        if len(toks) == 0:
            pooled_rows.append(jnp.zeros((D,), jnp.float32))
            continue
        t = jnp.array(toks, dtype=jnp.int32)
        e = params["emb"][t]                       # [n, D]
        b = params["boosts"][t, 0]                 # [n]
        w = b * (1.0 / len(toks))
        pooled_rows.append(jnp.sum(e * w[:, None], axis=0))
    h = jnp.stack(pooled_rows, axis=0)

    def hidden(h, w, b, g, bt):
        h = h @ w + b
        h = jnp.maximum(h, 0.0)
        mu = jnp.mean(h, axis=-1, keepdims=True)
        var = jnp.mean((h - mu) ** 2, axis=-1, keepdims=True)
        h = (h - mu) / jnp.sqrt(var + 1e-5)
        return h * g + bt

    h = hidden(h, params["w1"], params["b1"], params["g1"], params["bt1"])
    h = hidden(h, params["w2"], params["b2"], params["g2"], params["bt2"])
    return h @ params["wo"] + params["bo"]


if __name__ == "__main__":
    # Small, deterministic configuration consistent with the module:
    #   vocab V=64, embedding dim D=32, hidden_layer_sizes=[32, 32],
    #   include_layer_norms=True, output_size=16, batch B=2, max tokens L=8.
    V, D, H1, H2, O = 64, 32, 32, 32, 16
    B, L = 2, 8

    key = jax.random.PRNGKey(0)
    ks = jax.random.split(key, 10)
    params = {
        "emb":    jax.random.normal(ks[0], (V, D), jnp.float32) * 0.1,
        "boosts": jax.random.uniform(ks[1], (V, 1), jnp.float32, 0.5, 1.5),
        "w1":  jax.random.normal(ks[2], (D, H1), jnp.float32) * 0.1,
        "b1":  jax.random.normal(ks[3], (1, H1), jnp.float32) * 0.01,
        "g1":  jnp.ones((1, H1), jnp.float32),
        "bt1": jnp.zeros((1, H1), jnp.float32),
        "w2":  jax.random.normal(ks[4], (H1, H2), jnp.float32) * 0.1,
        "b2":  jax.random.normal(ks[5], (1, H2), jnp.float32) * 0.01,
        "g2":  jnp.ones((1, H2), jnp.float32),
        "bt2": jnp.zeros((1, H2), jnp.float32),
        "wo":  jax.random.normal(ks[6], (H2, O), jnp.float32) * 0.1,
        "bo":  jax.random.normal(ks[7], (1, O), jnp.float32) * 0.01,
    }

    # Token "bags" (equivalent of the list[list[int]] input), padded to L.
    tokens_list = [[3, 7, 12, 5], [40, 2, 9, 9, 21, 63]]
    tok_ids = jnp.zeros((B, L), jnp.int32)
    mask = jnp.zeros((B, L), jnp.float32)
    for i, toks in enumerate(tokens_list):
        tok_ids = tok_ids.at[i, :len(toks)].set(jnp.array(toks, jnp.int32))
        mask = mask.at[i, :len(toks)].set(1.0)
    bag_len = jnp.array([len(t) for t in tokens_list], jnp.int32)

    out = pooled_tower_forward(tok_ids, mask, bag_len, params)
    out = jax.block_until_ready(out)

    ref = ref_forward(tokens_list, params)
    assert out.shape == (B, O)
    assert jnp.allclose(out, ref, atol=1e-4, rtol=1e-4), (out, ref)

    print("KERNEL_OK")
</pallas_src>

<mosaic_0001>
module attributes {stable_mosaic.version = 11 : i64} {
  func.func @pooled_tower_kernel(%arg0: i32, %arg1: memref<8x8xi32, #tpu.memory_space<vmem>>, %arg2: memref<8x8xf32, #tpu.memory_space<vmem>>, %arg3: memref<1x64xf32, #tpu.memory_space<vmem>>, %arg4: memref<64x32xf32, #tpu.memory_space<vmem>>, %arg5: memref<96x128xf32, #tpu.memory_space<vmem>>, %arg6: memref<8x128xf32, #tpu.memory_space<vmem>>, %arg7: memref<8x128xf32, #tpu.memory_space<vmem>>) attributes {dimension_semantics = [#tpu.dimension_semantics<parallel>], iteration_bounds = array<i64: 1>, scalar_prefetch = 0 : i64, scratch_operands = 0 : i64, tpu.core_type = #tpu.core_type<tc>, window_params = [{transform_indices = @transform_0, window_bounds = array<i64: 8, 8>}, {transform_indices = @transform_1, window_bounds = array<i64: 8, 8>}, {pipeline_mode = #tpu.pipeline_mode<synchronous>, transform_indices = @transform_2, window_bounds = array<i64: 1, 64>}, {pipeline_mode = #tpu.pipeline_mode<synchronous>, transform_indices = @transform_3, window_bounds = array<i64: 64, 32>}, {pipeline_mode = #tpu.pipeline_mode<synchronous>, transform_indices = @transform_4, window_bounds = array<i64: 96, 128>}, {pipeline_mode = #tpu.pipeline_mode<synchronous>, transform_indices = @transform_5, window_bounds = array<i64: 8, 128>}, {transform_indices = @transform_6, window_bounds = array<i64: 8, 128>}]} {
    %c0 = arith.constant 0 : index
    %c0_0 = arith.constant 0 : index
    %0 = vector.load %arg1[%c0, %c0_0] : memref<8x8xi32, #tpu.memory_space<vmem>>, vector<8x8xi32>
    %c0_1 = arith.constant 0 : index
    %c0_2 = arith.constant 0 : index
    %1 = vector.load %arg2[%c0_1, %c0_2] : memref<8x8xf32, #tpu.memory_space<vmem>>, vector<8x8xf32>
    %2 = tpu.iota {dimensions = array<i32: 1>} : vector<8x64xi32>
    %cst = arith.constant 0.000000e+00 : f32
    %3 = vector.broadcast %cst : f32 to vector<8x64xf32>
    %4 = vector.extract_strided_slice %0 {offsets = [0, 0], sizes = [8, 1], strides = [1, 1]} : vector<8x8xi32> to vector<8x1xi32>
    %5 = vector.broadcast %4 : vector<8x1xi32> to vector<8x64xi32>
    %6 = arith.cmpi eq, %5, %2 : vector<8x64xi32>
    %7 = vector.extract_strided_slice %1 {offsets = [0, 0], sizes = [8, 1], strides = [1, 1]} : vector<8x8xf32> to vector<8x1xf32>
    %cst_3 = arith.constant 0.000000e+00 : f32
    %8 = vector.shape_cast %7 : vector<8x1xf32> to vector<8x1xf32>
    %9 = vector.broadcast %8 : vector<8x1xf32> to vector<8x64xf32>
    %10 = vector.broadcast %cst_3 : f32 to vector<8x64xf32>
    %11 = arith.select %6, %9, %10 : vector<8x64xi1>, vector<8x64xf32>
    %12 = arith.addf %3, %11 : vector<8x64xf32>
    %13 = vector.extract_strided_slice %0 {offsets = [0, 1], sizes = [8, 1], strides = [1, 1]} : vector<8x8xi32> to vector<8x1xi32>
    %14 = vector.broadcast %13 : vector<8x1xi32> to vector<8x64xi32>
    %15 = arith.cmpi eq, %14, %2 : vector<8x64xi32>
    %16 = vector.extract_strided_slice %1 {offsets = [0, 1], sizes = [8, 1], strides = [1, 1]} : vector<8x8xf32> to vector<8x1xf32>
    %cst_4 = arith.constant 0.000000e+00 : f32
    %17 = vector.shape_cast %16 : vector<8x1xf32> to vector<8x1xf32>
    %18 = vector.broadcast %17 : vector<8x1xf32> to vector<8x64xf32>
    %19 = vector.broadcast %cst_4 : f32 to vector<8x64xf32>
    %20 = arith.select %15, %18, %19 : vector<8x64xi1>, vector<8x64xf32>
    %21 = arith.addf %12, %20 : vector<8x64xf32>
    %22 = vector.extract_strided_slice %0 {offsets = [0, 2], sizes = [8, 1], strides = [1, 1]} : vector<8x8xi32> to vector<8x1xi32>
    %23 = vector.broadcast %22 : vector<8x1xi32> to vector<8x64xi32>
    %24 = arith.cmpi eq, %23, %2 : vector<8x64xi32>
    %25 = vector.extract_strided_slice %1 {offsets = [0, 2], sizes = [8, 1], strides = [1, 1]} : vector<8x8xf32> to vector<8x1xf32>
    %cst_5 = arith.constant 0.000000e+00 : f32
    %26 = vector.shape_cast %25 : vector<8x1xf32> to vector<8x1xf32>
    %27 = vector.broadcast %26 : vector<8x1xf32> to vector<8x64xf32>
    %28 = vector.broadcast %cst_5 : f32 to vector<8x64xf32>
    %29 = arith.select %24, %27, %28 : vector<8x64xi1>, vector<8x64xf32>
    %30 = arith.addf %21, %29 : vector<8x64xf32>
    %31 = vector.extract_strided_slice %0 {offsets = [0, 3], sizes = [8, 1], strides = [1, 1]} : vector<8x8xi32> to vector<8x1xi32>
    %32 = vector.broadcast %31 : vector<8x1xi32> to vector<8x64xi32>
    %33 = arith.cmpi eq, %32, %2 : vector<8x64xi32>
    %34 = vector.extract_strided_slice %1 {offsets = [0, 3], sizes = [8, 1], strides = [1, 1]} : vector<8x8xf32> to vector<8x1xf32>
    %cst_6 = arith.constant 0.000000e+00 : f32
    %35 = vector.shape_cast %34 : vector<8x1xf32> to vector<8x1xf32>
    %36 = vector.broadcast %35 : vector<8x1xf32> to vector<8x64xf32>
    %37 = vector.broadcast %cst_6 : f32 to vector<8x64xf32>
    %38 = arith.select %33, %36, %37 : vector<8x64xi1>, vector<8x64xf32>
    %39 = arith.addf %30, %38 : vector<8x64xf32>
    %40 = vector.extract_strided_slice %0 {offsets = [0, 4], sizes = [8, 1], strides = [1, 1]} : vector<8x8xi32> to vector<8x1xi32>
    %41 = vector.broadcast %40 : vector<8x1xi32> to vector<8x64xi32>
    %42 = arith.cmpi eq, %41, %2 : vector<8x64xi32>
    %43 = vector.extract_strided_slice %1 {offsets = [0, 4], sizes = [8, 1], strides = [1, 1]} : vector<8x8xf32> to vector<8x1xf32>
    %cst_7 = arith.constant 0.000000e+00 : f32
    %44 = vector.shape_cast %43 : vector<8x1xf32> to vector<8x1xf32>
    %45 = vector.broadcast %44 : vector<8x1xf32> to vector<8x64xf32>
    %46 = vector.broadcast %cst_7 : f32 to vector<8x64xf32>
    %47 = arith.select %42, %45, %46 : vector<8x64xi1>, vector<8x64xf32>
    %48 = arith.addf %39, %47 : vector<8x64xf32>
    %49 = vector.extract_strided_slice %0 {offsets = [0, 5], sizes = [8, 1], strides = [1, 1]} : vector<8x8xi32> to vector<8x1xi32>
    %50 = vector.broadcast %49 : vector<8x1xi32> to vector<8x64xi32>
    %51 = arith.cmpi eq, %50, %2 : vector<8x64xi32>
    %52 = vector.extract_strided_slice %1 {offsets = [0, 5], sizes = [8, 1], strides = [1, 1]} : vector<8x8xf32> to vector<8x1xf32>
    %cst_8 = arith.constant 0.000000e+00 : f32
    %53 = vector.shape_cast %52 : vector<8x1xf32> to vector<8x1xf32>
    %54 = vector.broadcast %53 : vector<8x1xf32> to vector<8x64xf32>
    %55 = vector.broadcast %cst_8 : f32 to vector<8x64xf32>
    %56 = arith.select %51, %54, %55 : vector<8x64xi1>, vector<8x64xf32>
    %57 = arith.addf %48, %56 : vector<8x64xf32>
    %58 = vector.extract_strided_slice %0 {offsets = [0, 6], sizes = [8, 1], strides = [1, 1]} : vector<8x8xi32> to vector<8x1xi32>
    %59 = vector.broadcast %58 : vector<8x1xi32> to vector<8x64xi32>
    %60 = arith.cmpi eq, %59, %2 : vector<8x64xi32>
    %61 = vector.extract_strided_slice %1 {offsets = [0, 6], sizes = [8, 1], strides = [1, 1]} : vector<8x8xf32> to vector<8x1xf32>
    %cst_9 = arith.constant 0.000000e+00 : f32
    %62 = vector.shape_cast %61 : vector<8x1xf32> to vector<8x1xf32>
    %63 = vector.broadcast %62 : vector<8x1xf32> to vector<8x64xf32>
    %64 = vector.broadcast %cst_9 : f32 to vector<8x64xf32>
    %65 = arith.select %60, %63, %64 : vector<8x64xi1>, vector<8x64xf32>
    %66 = arith.addf %57, %65 : vector<8x64xf32>
    %67 = vector.extract_strided_slice %0 {offsets = [0, 7], sizes = [8, 1], strides = [1, 1]} : vector<8x8xi32> to vector<8x1xi32>
    %68 = vector.broadcast %67 : vector<8x1xi32> to vector<8x64xi32>
    %69 = arith.cmpi eq, %68, %2 : vector<8x64xi32>
    %70 = vector.extract_strided_slice %1 {offsets = [0, 7], sizes = [8, 1], strides = [1, 1]} : vector<8x8xf32> to vector<8x1xf32>
    %cst_10 = arith.constant 0.000000e+00 : f32
    %71 = vector.shape_cast %70 : vector<8x1xf32> to vector<8x1xf32>
    %72 = vector.broadcast %71 : vector<8x1xf32> to vector<8x64xf32>
    %73 = vector.broadcast %cst_10 : f32 to vector<8x64xf32>
    %74 = arith.select %69, %72, %73 : vector<8x64xi1>, vector<8x64xf32>
    %75 = arith.addf %66, %74 : vector<8x64xf32>
    %c0_11 = arith.constant 0 : index
    %c0_12 = arith.constant 0 : index
    %76 = vector.load %arg3[%c0_11, %c0_12] : memref<1x64xf32, #tpu.memory_space<vmem>>, vector<1x64xf32>
    %77 = vector.broadcast %76 : vector<1x64xf32> to vector<8x64xf32>
    %78 = arith.mulf %75, %77 : vector<8x64xf32>
    %c0_13 = arith.constant 0 : index
    %c0_14 = arith.constant 0 : index
    %79 = vector.load %arg4[%c0_13, %c0_14] : memref<64x32xf32, #tpu.memory_space<vmem>>, vector<64x32xf32>
    %cst_15 = arith.constant dense<0.000000e+00> : vector<8x32xf32>
    %80 = tpu.matmul %78, %79, %cst_15 {dimension_numbers = #tpu.dot_dimension_numbers<[1], [0], [0], [1], [0, 0, 1, 1], [], []>} : vector<8x64xf32>, vector<64x32xf32>, vector<8x32xf32> -> vector<8x32xf32>
    %c0_16 = arith.constant 0 : index
    %c0_17 = arith.constant 0 : index
    %81 = vector.load %arg5[%c0_16, %c0_17] : memref<96x128xf32, #tpu.memory_space<vmem>>, vector<96x128xf32>
    %82 = vector.extract_strided_slice %81 {offsets = [0, 0], sizes = [32, 32], strides = [1, 1]} : vector<96x128xf32> to vector<32x32xf32>
    %83 = vector.extract_strided_slice %81 {offsets = [32, 0], sizes = [32, 32], strides = [1, 1]} : vector<96x128xf32> to vector<32x32xf32>
    %84 = vector.extract_strided_slice %81 {offsets = [64, 0], sizes = [32, 128], strides = [1, 1]} : vector<96x128xf32> to vector<32x128xf32>
    %c0_18 = arith.constant 0 : index
    %c0_19 = arith.constant 0 : index
    %85 = vector.load %arg6[%c0_18, %c0_19] : memref<8x128xf32, #tpu.memory_space<vmem>>, vector<8x128xf32>
    %86 = vector.extract_strided_slice %85 {offsets = [0, 0], sizes = [1, 32], strides = [1, 1]} : vector<8x128xf32> to vector<1x32xf32>
    %87 = vector.extract_strided_slice %85 {offsets = [1, 0], sizes = [1, 32], strides = [1, 1]} : vector<8x128xf32> to vector<1x32xf32>
    %88 = vector.extract_strided_slice %85 {offsets = [2, 0], sizes = [1, 32], strides = [1, 1]} : vector<8x128xf32> to vector<1x32xf32>
    %89 = vector.extract_strided_slice %85 {offsets = [3, 0], sizes = [1, 32], strides = [1, 1]} : vector<8x128xf32> to vector<1x32xf32>
    %90 = vector.extract_strided_slice %85 {offsets = [4, 0], sizes = [1, 32], strides = [1, 1]} : vector<8x128xf32> to vector<1x32xf32>
    %91 = vector.extract_strided_slice %85 {offsets = [5, 0], sizes = [1, 32], strides = [1, 1]} : vector<8x128xf32> to vector<1x32xf32>
    %92 = vector.extract_strided_slice %85 {offsets = [6, 0], sizes = [1, 128], strides = [1, 1]} : vector<8x128xf32> to vector<1x128xf32>
    %cst_20 = arith.constant dense<0.000000e+00> : vector<8x32xf32>
    %93 = tpu.matmul %80, %82, %cst_20 {dimension_numbers = #tpu.dot_dimension_numbers<[1], [0], [0], [1], [0, 0, 1, 1], [], []>} : vector<8x32xf32>, vector<32x32xf32>, vector<8x32xf32> -> vector<8x32xf32>
    %94 = vector.broadcast %86 : vector<1x32xf32> to vector<8x32xf32>
    %95 = arith.addf %93, %94 : vector<8x32xf32>
    %cst_21 = arith.constant 0.000000e+00 : f32
    %96 = vector.broadcast %cst_21 : f32 to vector<8x32xf32>
    %97 = arith.maximumf %95, %96 : vector<8x32xf32>
    %cst_22 = arith.constant dense<0.000000e+00> : vector<8xf32>
    %98 = vector.multi_reduction <add>, %97, %cst_22 [1] : vector<8x32xf32> to vector<8xf32>
    %99 = vector.shape_cast %98 : vector<8xf32> to vector<8x1xf32>
    %100 = arith.mulf %97, %97 : vector<8x32xf32>
    %cst_23 = arith.constant dense<0.000000e+00> : vector<8xf32>
    %101 = vector.multi_reduction <add>, %100, %cst_23 [1] : vector<8x32xf32> to vector<8xf32>
    %102 = vector.shape_cast %101 : vector<8xf32> to vector<8x1xf32>
    %cst_24 = arith.constant 3.125000e-02 : f32
    %103 = vector.broadcast %cst_24 : f32 to vector<8x1xf32>
    %104 = arith.mulf %99, %103 : vector<8x1xf32>
    %cst_25 = arith.constant 3.125000e-02 : f32
    %105 = vector.broadcast %cst_25 : f32 to vector<8x1xf32>
    %106 = arith.mulf %102, %105 : vector<8x1xf32>
    %107 = arith.mulf %104, %104 : vector<8x1xf32>
    %108 = arith.subf %106, %107 : vector<8x1xf32>
    %109 = vector.broadcast %104 : vector<8x1xf32> to vector<8x32xf32>
    %110 = arith.subf %97, %109 : vector<8x32xf32>
    %cst_26 = arith.constant 9.99999974E-6 : f32
    %111 = vector.broadcast %cst_26 : f32 to vector<8x1xf32>
    %112 = arith.addf %108, %111 : vector<8x1xf32>
    %113 = math.rsqrt %112 : vector<8x1xf32>
    %114 = vector.broadcast %113 : vector<8x1xf32> to vector<8x32xf32>
    %115 = arith.mulf %110, %114 : vector<8x32xf32>
    %116 = vector.broadcast %87 : vector<1x32xf32> to vector<8x32xf32>
    %117 = arith.mulf %115, %116 : vector<8x32xf32>
    %118 = vector.broadcast %88 : vector<1x32xf32> to vector<8x32xf32>
    %119 = arith.addf %117, %118 : vector<8x32xf32>
    %cst_27 = arith.constant dense<0.000000e+00> : vector<8x32xf32>
    %120 = tpu.matmul %119, %83, %cst_27 {dimension_numbers = #tpu.dot_dimension_numbers<[1], [0], [0], [1], [0, 0, 1, 1], [], []>} : vector<8x32xf32>, vector<32x32xf32>, vector<8x32xf32> -> vector<8x32xf32>
    %121 = vector.broadcast %89 : vector<1x32xf32> to vector<8x32xf32>
    %122 = arith.addf %120, %121 : vector<8x32xf32>
    %cst_28 = arith.constant 0.000000e+00 : f32
    %123 = vector.broadcast %cst_28 : f32 to vector<8x32xf32>
    %124 = arith.maximumf %122, %123 : vector<8x32xf32>
    %cst_29 = arith.constant dense<0.000000e+00> : vector<8xf32>
    %125 = vector.multi_reduction <add>, %124, %cst_29 [1] : vector<8x32xf32> to vector<8xf32>
    %126 = vector.shape_cast %125 : vector<8xf32> to vector<8x1xf32>
    %127 = arith.mulf %124, %124 : vector<8x32xf32>
    %cst_30 = arith.constant dense<0.000000e+00> : vector<8xf32>
    %128 = vector.multi_reduction <add>, %127, %cst_30 [1] : vector<8x32xf32> to vector<8xf32>
    %129 = vector.shape_cast %128 : vector<8xf32> to vector<8x1xf32>
    %cst_31 = arith.constant 3.125000e-02 : f32
    %130 = vector.broadcast %cst_31 : f32 to vector<8x1xf32>
    %131 = arith.mulf %126, %130 : vector<8x1xf32>
    %cst_32 = arith.constant 3.125000e-02 : f32
    %132 = vector.broadcast %cst_32 : f32 to vector<8x1xf32>
    %133 = arith.mulf %129, %132 : vector<8x1xf32>
    %134 = arith.mulf %131, %131 : vector<8x1xf32>
    %135 = arith.subf %133, %134 : vector<8x1xf32>
    %136 = vector.broadcast %131 : vector<8x1xf32> to vector<8x32xf32>
    %137 = arith.subf %124, %136 : vector<8x32xf32>
    %cst_33 = arith.constant 9.99999974E-6 : f32
    %138 = vector.broadcast %cst_33 : f32 to vector<8x1xf32>
    %139 = arith.addf %135, %138 : vector<8x1xf32>
    %140 = math.rsqrt %139 : vector<8x1xf32>
    %141 = vector.broadcast %140 : vector<8x1xf32> to vector<8x32xf32>
    %142 = arith.mulf %137, %141 : vector<8x32xf32>
    %143 = vector.broadcast %90 : vector<1x32xf32> to vector<8x32xf32>
    %144 = arith.mulf %142, %143 : vector<8x32xf32>
    %145 = vector.broadcast %91 : vector<1x32xf32> to vector<8x32xf32>
    %146 = arith.addf %144, %145 : vector<8x32xf32>
    %cst_34 = arith.constant dense<0.000000e+00> : vector<8x128xf32>
    %147 = tpu.matmul %146, %84, %cst_34 {dimension_numbers = #tpu.dot_dimension_numbers<[1], [0], [0], [1], [0, 0, 1, 1], [], []>} : vector<8x32xf32>, vector<32x128xf32>, vector<8x128xf32> -> vector<8x128xf32>
    %148 = vector.broadcast %92 : vector<1x128xf32> to vector<8x128xf32>
    %149 = arith.addf %147, %148 : vector<8x128xf32>
    %c0_35 = arith.constant 0 : index
    %c0_36 = arith.constant 0 : index
    %150 = vector.load %arg7[%c0_35, %c0_36] : memref<8x128xf32, #tpu.memory_space<vmem>>, vector<8x128xf32>
    tpu.vector_store %arg7[%c0_35, %c0_36], %149 {strides = array<i32>} : memref<8x128xf32, #tpu.memory_space<vmem>>, vector<8x128xf32>,
    return
  }
  func.func @transform_0(%arg0: i32) -> (i32, i32) {
    %c0_i32 = arith.constant 0 : i32
    %c0_i32_0 = arith.constant 0 : i32
    return %arg0, %c0_i32 : i32, i32
  }
  func.func @transform_1(%arg0: i32) -> (i32, i32) {
    %c0_i32 = arith.constant 0 : i32
    %c0_i32_0 = arith.constant 0 : i32
    return %arg0, %c0_i32 : i32, i32
  }
  func.func @transform_2(%arg0: i32) -> (i32, i32) {
    %c0_i32 = arith.constant 0 : i32
    %c0_i32_0 = arith.constant 0 : i32
    %c0_i32_1 = arith.constant 0 : i32
    return %c0_i32, %c0_i32_0 : i32, i32
  }
  func.func @transform_3(%arg0: i32) -> (i32, i32) {
    %c0_i32 = arith.constant 0 : i32
    %c0_i32_0 = arith.constant 0 : i32
    %c0_i32_1 = arith.constant 0 : i32
    return %c0_i32, %c0_i32_0 : i32, i32
  }
  func.func @transform_4(%arg0: i32) -> (i32, i32) {
    %c0_i32 = arith.constant 0 : i32
    %c0_i32_0 = arith.constant 0 : i32
    %c0_i32_1 = arith.constant 0 : i32
    return %c0_i32, %c0_i32_0 : i32, i32
  }
  func.func @transform_5(%arg0: i32) -> (i32, i32) {
    %c0_i32 = arith.constant 0 : i32
    %c0_i32_0 = arith.constant 0 : i32
    %c0_i32_1 = arith.constant 0 : i32
    return %c0_i32, %c0_i32_0 : i32, i32
  }
  func.func @transform_6(%arg0: i32) -> (i32, i32) {
    %c0_i32 = arith.constant 0 : i32
    %c0_i32_0 = arith.constant 0 : i32
    return %arg0, %c0_i32 : i32, i32
  }
}

</mosaic_0001>

<bundles_post_ra>
// kernel: tpu_custom_call.1
= control target key start
LH: loop header
LB: loop body
LE: loop exit
PB: predicated region body
PF: predicated region fallthrough
CT: control target
= control target key end

     0   :  { %11 = vsyncpa [#allocation3], 0  ;;  %s627_s0 = inlined_call_operand.hbm [shape: s32[8,8], index: 0, kind: input, shape index: {}]   ;;  %s628_s1 = inlined_call_operand.hbm [shape: f32[8,8], index: 1, kind: input, shape index: {}]   ;;  %s629_s2 = inlined_call_operand.vmem [shape: f32[1,64], index: 2, kind: input, shape index: {}]   ;;  %s630_s3 = inlined_call_operand.vmem [shape: f32[64,32], index: 3, kind: input, shape index: {}]   ;;  %s631_s4 = inlined_call_operand.vmem [shape: f32[96,128], index: 4, kind: input, shape index: {}]   ;;  %s632_s5 = inlined_call_operand.hbm [shape: f32[8,128], index: 5, kind: input, shape index: {}]   ;;  %s633_s6 = inlined_call_operand.hbm [shape: f32[8,128], index: 6, kind: output, shape index: {}]  }
   0x1   :  { %12 = vsyncpa [#allocation6], 0  ;;  %s30_s23 = sshll.u32 %s628_s1, 4  ;;  %s31_s23 = int_to_ptr.hbm [resolvable:$true] %s30_s23 }
   0x2   :  { %13 = vsyncpa [#allocation4], 0  ;;  %s489_s24 = smov [#allocation5]   ;;  %s19_s28 = sshll.u32 %s627_s0, 4  ;;  %s20_s28 = int_to_ptr.hbm [resolvable:$true] %s19_s28 }
   0x3   :  { %s32_s25 = sshll.u32 %s489_s24, 4  ;;  %s490_s29 = smov [#allocation2]   ;;  %s33_s25 = int_to_ptr.vmem [resolvable:$true] %s32_s25 }
   0x4   :  { %35 = dma.hbm_to_vmem [thread:$0]  %s31_s23, 128, %s33_s25, [#allocation6]  }
   0x5   :  { %s21_s30 = sshll.u32 %s490_s29, 4  ;;  %s47_s9 = sshll.u32 %s632_s5, 4  ;;  %s22_s30 = int_to_ptr.vmem [resolvable:$true] %s21_s30  ;;  %s48_s9 = int_to_ptr.hbm [resolvable:$true] %s47_s9 }
   0x6   :  { %24 = dma.hbm_to_vmem [thread:$0]  %s20_s28, 128, %s22_s30, [#allocation3]  }
   0x7   :  { %s491_s1 = smov [#allocation7]  }
   0x8   :  { %s49_s10 = sshll.u32 %s491_s1, 4  ;;  %s50_s10 = int_to_ptr.vmem [resolvable:$true] %s49_s10 }
   0x9   :  { %52 = dma.hbm_to_vmem [thread:$0]  %s48_s9, 128, %s50_s10, [#allocation6]  }
   0xa   :  { %483 = dma.done.wait [#allocation3], 128  }
   0xb   :  { %484 = vsyncadd [#allocation3], 4294967168 }
   0xc   :  { %485 = dma.done.wait [#allocation6], 256  }
   0xd   :  { %486 = vsyncadd [#allocation6], 4294967040  ;;  %v492_v0 = vmov 0   ;;  %v493_v1 = vmov 2   ;;  %v66_v2 = vld [vmem:[#allocation5] sm:$0xff]  ;;  %v65_v3 = vld [vmem:[#allocation2] sm:$0xff]  ;;  %v67_v25 = vlaneseq }
   0xe   :  { %368 = vset.pattern.permute.xlu1 %v492_v0  ;;  %366 = vset.pattern.permute.xlu0 %v492_v0  ;;  %v494_v4 = vmov 1   ;;  %v495_v5 = vmov 3   ;;  %v496_v6 = vmov 4   ;;  %v497_v7 = vmov 6   ;;  %v162_v12 = vld [vmem:[%s630_s3 + $0x38] sm:$0xff]  ;;  %v161_v14 = vld [vmem:[%s630_s3 + $0x30] sm:$0xff] }
   0xf   :  { %370 = vset.pattern.permute.xlu2 %v493_v1  ;;  %75 = vperm.xlu1 %368, %v66_v2   ;;  %v498_v8 = vmov 5   ;;  %v499_v9 = vmov 7   ;;  %v160_v15 = vld [vmem:[%s630_s3 + $0x28] sm:$0xff]  ;;  %v159_v16 = vld [vmem:[%s630_s3 + $0x20] sm:$0xff]  ;;  %v158_v18 = vld [vmem:[%s630_s3 + $0x18] sm:$0xff]  ;;  %v68_v30 = vand.u32 127, %v67_v25 }
  0x10   :  { %70 = vperm.xlu0 %366, %v65_v3   ;;  %91 = vperm.xlu2 %370, %v65_v3   ;;  %v157_v21 = vld [vmem:[%s630_s3 + $0x10] sm:$0xff]  ;;  %v156_v22 = vld [vmem:[%s630_s3 + $0x8] sm:$0xff]  ;;  %v155_v24 = vld [vmem:[%s630_s3] sm:$0xff]  ;;  %vm163_vm8 = vcmask 523264   ;;  %vm201_vm9 = vcmask 261120   ;;  %s339_s25 = sshll.u32 %s633_s6, 4  ;;  %s340_s25 = int_to_ptr.hbm [resolvable:$true] %s339_s25 }
  0x11   :  { %175 = vmatpush.msra.mxu0 %v162_v12  ;;  %v190_v26 = vld [vmem:[%s631_s4 + $0x18] sm:$0xff]  ;;  %v189_v27 = vld [vmem:[%s631_s4 + $0x10] sm:$0xff]  ;;  %v188_v28 = vld [vmem:[%s631_s4 + $0x8] sm:$0xff] }
  0x12   :  { %217 = vmatpush.msra.mxu1 %v190_v26  ;;  %v382_v52 = vld [vmem:[%s629_s2] ss:$0 sm:$0xff]  ;;  %v585_v58 = vld [vmem:[#allocation7] sm:$0xff] }
  0x13   :  { %176 = vmatpush.msra.mxu0 %v161_v14  ;;  %v187_v56 = vld [vmem:[%s631_s4] sm:$0xff]  ;;  %v200_v59 = vperm.slane %v585_v58, 0  ;;  %v254_v26 = vperm.slane %v585_v58, 3 }
  0x14   :  { %218 = vmatpush.msra.mxu1 %v189_v27 }
  0x15   :  { %177 = vmatpush.msra.mxu0 %v160_v15 }
  0x16   :  { %219 = vmatpush.msra.mxu1 %v188_v28 }
  0x17   :  { %369 = vset.pattern.permute.xlu1 %v494_v4  ;;  %178 = vmatpush.msra.mxu0 %v159_v16 }
  0x18   :  { %367 = vset.pattern.permute.xlu0 %v494_v4  ;;  %85 = vperm.xlu1 %369, %v66_v2   ;;  %v192_v4 = vld [vmem:[%s631_s4 + $0x28] sm:$0xff] }
  0x19   :  { %81 = vperm.xlu0 %367, %v65_v3   ;;  %95 = vperm.xlu2 %370, %v66_v2  }
  0x1a   :  { %179 = vmatpush.msra.mxu0 %v158_v18  ;;  %220 = vmatpush.msra.mxu1 %v187_v56 }
  0x1c   :  { %180 = vmatpush.msra.mxu0 %v157_v21 }
  0x1e   :  { %181 = vmatpush.msra.mxu0 %v156_v22 }
  0x20   :  { %371 = vset.pattern.permute.xlu1 %v495_v5  ;;  %182 = vmatpush.msra.mxu0 %v155_v24 }
  0x21   :  { %373 = vset.pattern.permute.xlu0 %v496_v6  ;;  %101 = vperm.xlu1 %371, %v65_v3  }
  0x22   :  { %111 = vperm.xlu0 %373, %v65_v3   ;;  %372 = vset.pattern.permute.xlu2 %v495_v5  ;;  %v191_v5 = vld [vmem:[%s631_s4 + $0x20] sm:$0xff] }
  0x23   :  { %105 = vperm.xlu2 %372, %v66_v2  }
  0x29   :  { %374 = vset.pattern.permute.xlu1 %v496_v6 }
  0x2a   :  { %378 = vset.pattern.permute.xlu0 %v497_v7  ;;  %115 = vperm.xlu1 %374, %v66_v2  }
  0x2b   :  { %135 = vperm.xlu0 %378, %v66_v2   ;;  %375 = vset.pattern.permute.xlu2 %v498_v8 }
  0x2c   :  { %121 = vperm.xlu2 %375, %v65_v3  }
  0x32   :  { %376 = vset.pattern.permute.xlu1 %v498_v8 }
  0x33   :  { %381 = vset.pattern.permute.xlu0 %v499_v9  ;;  %125 = vperm.xlu1 %376, %v66_v2  }
  0x34   :  { %377 = vset.pattern.permute.xlu2 %v497_v7 }
  0x35   :  { %131 = vperm.xlu2 %377, %v65_v3  }
  0x3b   :  { %379 = vset.pattern.permute.xlu1 %v499_v9 }
  0x3c   :  { %141 = vperm.xlu1 %379, %v65_v3   ;;  %v193_v3 = vld [vmem:[%s631_s4 + $0x30] sm:$0xff] }
  0x3d   :  { %380 = vset.pattern.permute.xlu2 %v499_v9 }
  0x3e   :  { %145 = vperm.xlu2 %380, %v66_v2   ;;  %v194_v2 = vld [vmem:[%s631_s4 + $0x38] sm:$0xff] }
  0x3f   :  { %270 = vmatpush.msra.mxu2 %v194_v2 }
  0x41   :  { %271 = vmatpush.msra.mxu2 %v193_v3 }
  0x43   :  { %272 = vmatpush.msra.mxu2 %v192_v4 }
  0x45   :  { %273 = vmatpush.msra.mxu2 %v191_v5 }
  0x6a   :  { %v92_v10 = vpop.permute.xlu2 %91 }
  0x6b   :  { %vm93_vm2 = vcmp.eq.s32.totalorder %v92_v10, %v68_v30 }
  0x73   :  { %v96_v13 = vpop.permute.xlu2 %95 }
  0x74   :  { %v98_v38 = vsel %vm93_vm2, %v96_v13, 0.0 }
  0x7d   :  { %v106_v20 = vpop.permute.xlu2 %105 }
  0x81   :  { %v76_v11 = vpop.permute.xlu1 %75 }
  0x82   :  { %v71_v19 = vpop.permute.xlu0 %70 }
  0x83   :  { %vm72_vm1 = vcmp.eq.s32.totalorder %v71_v19, %v68_v30 }
  0x84   :  { %v78_v34 = vsel %vm72_vm1, %v76_v11, 0.0 }
  0x86   :  { %v122_v31 = vpop.permute.xlu2 %121 }
  0x87   :  { %vm123_vm5 = vcmp.eq.s32.totalorder %v122_v31, %v68_v30 }
  0x8a   :  { %v86_v17 = vpop.permute.xlu1 %85 }
  0x8b   :  { %v82_v29 = vpop.permute.xlu0 %81 }
  0x8c   :  { %vm83_vm0 = vcmp.eq.s32.totalorder %v82_v29, %v68_v30 }
  0x8d   :  { %v88_v33 = vsel %vm83_vm0, %v86_v17, 0.0 }
  0x8e   :  { %v89_v36 = vadd.f32 %v88_v33, %v78_v34  ;;  %v198_v33 = vld [vmem:[%s631_s4 + $0x58] sm:$0xff]  ;;  %v197_v34 = vld [vmem:[%s631_s4 + $0x50] sm:$0xff] }
  0x8f   :  { %v132_v37 = vpop.permute.xlu2 %131  ;;  %323 = vmatpush.msra.mxu3 %v198_v33 }
  0x90   :  { %v99_v40 = vadd.f32 %v98_v38, %v89_v36  ;;  %vm133_vm6 = vcmp.eq.s32.totalorder %v132_v37, %v68_v30  ;;  %v195_v36 = vld [vmem:[%s631_s4 + $0x40] sm:$0xff] }
  0x91   :  { %324 = vmatpush.msra.mxu3 %v197_v34 }
  0x93   :  { %v102_v23 = vpop.permute.xlu1 %101 }
  0x94   :  { %v112_v35 = vpop.permute.xlu0 %111  ;;  %vm103_vm3 = vcmp.eq.s32.totalorder %v102_v23, %v68_v30  ;;  %v252_v23 = vperm.slane %v585_v58, 2 }
  0x95   :  { %vm113_vm4 = vcmp.eq.s32.totalorder %v112_v35, %v68_v30  ;;  %v108_v39 = vsel %vm103_vm3, %v106_v20, 0.0  ;;  %v250_v20 = vperm.slane %v585_v58, 1  ;;  %v196_v35 = vld [vmem:[%s631_s4 + $0x48] sm:$0xff]  ;;  %s500_s4 = smov [#allocation8]  }
  0x96   :  { %v109_v43 = vadd.f32 %v108_v39, %v99_v40  ;;  %325 = vmatpush.msra.mxu3 %v196_v35  ;;  %s337_s22 = sshll.u32 %s500_s4, 4  ;;  %s338_s22 = int_to_ptr.vmem [resolvable:$true] %s337_s22 }
  0x98   :  { %v146_v49 = vpop.permute.xlu2 %145  ;;  %326 = vmatpush.msra.mxu3 %v195_v36 }
  0x9c   :  { %v116_v32 = vpop.permute.xlu1 %115 }
  0x9d   :  { %v118_v42 = vsel %vm113_vm4, %v116_v32, 0.0  ;;  %v136_v46 = vpop.permute.xlu0 %135 }
  0x9e   :  { %v119_v45 = vadd.f32 %v118_v42, %v109_v43  ;;  %v138_v48 = vsel %vm133_vm6, %v136_v46, 0.0 }
  0xa5   :  { %v126_v41 = vpop.permute.xlu1 %125 }
  0xa6   :  { %v128_v44 = vsel %vm123_vm5, %v126_v41, 0.0 }
  0xa7   :  { %v129_v47 = vadd.f32 %v128_v44, %v119_v45 }
  0xa9   :  { %v139_v51 = vadd.f32 %v138_v48, %v129_v47 }
  0xae   :  { %v142_v50 = vpop.permute.xlu1 %141 }
  0xaf   :  { %vm143_vm7 = vcmp.eq.s32.totalorder %v142_v50, %v68_v30 }
  0xb0   :  { %v148_v53 = vsel %vm143_vm7, %v146_v49, 0.0 }
  0xb1   :  { %v149_v54 = vadd.f32 %v148_v53, %v139_v51  ;;  %v303_v51 = vperm.slane %v585_v58, 4 }
  0xb3   :  { %v154_v55 = vmul.f32 %v382_v52, %v149_v54  ;;  %v305_v54 = vperm.slane %v585_v58, 5 }
  0xb5   :  { %350 = vmatmul.msk.f32.vlgmr.msra.gmra.mxu0 %vm163_vm8, %v154_v55 }
 0x132   :  { %v184_v57 = vpop.f32.mrf.mxu0 }
 0x133   :  { %351 = vmatmul.msk.f32.vlgmr.msra.gmra.mxu1 %vm201_vm9, %v184_v57  ;;  %v307_v57 = vperm.slane %v585_v58, 6 }
 0x1b0   :  { %v222_v60 = vpop.f32.mrf.mxu1 }
 0x1b1   :  { %v223_v61 = vadd.f32 %v222_v60, %v200_v59 }
 0x1b3   :  { %v225_v62 = vmax.f32 %v223_v61, 0.0 }
 0x1b5   :  { %v226_v63 = vsel %vm201_vm9, %v225_v62, 0.0  ;;  %v229_v0 = vmul.f32 %v225_v62, %v225_v62 }
 0x1b6   :  { %227 = vadd.xlane.f32.xlu1 %v226_v63 }
 0x1b7   :  { %v230_v1 = vsel %vm201_vm9, %v229_v0, 0.0 }
 0x1b8   :  { %231 = vadd.xlane.f32.xlu2 %v230_v1 }
 0x229   :  { %v228_v6 = vpop.xlane.xlu1 %227 }
 0x22a   :  { %v233_v7 = vmul.f32 0.03125, %v228_v6 }
 0x22b   :  { %v232_v8 = vpop.xlane.xlu2 %231 }
 0x22c   :  { %v235_v9 = vmul.f32 %v233_v7, %v233_v7  ;;  %v234_v10 = vmul.f32 0.03125, %v232_v8  ;;  %v237_v19 = vsub.f32 %v225_v62, %v233_v7 }
 0x22e   :  { %v236_v11 = vsub.f32 %v234_v10, %v235_v9 }
 0x230   :  { %v238_v12 = vadd.f32 1e-05, %v236_v11 }
 0x232   :  { %383 = vrsqrt.f32 %v238_v12  ;;  %vm245_vm11 = vweird.f32 %v238_v12 }
 0x238   :  { %v384_v13 = vpop.eup %383 }
 0x239   :  { %v240_v14 = vmul.f32 %v384_v13, %v238_v12  ;;  %vm246_vm10 = vweird.f32 %v384_v13 }
 0x23a   :  { %vm247_vm12 = vmor %vm245_vm11, %vm246_vm10 }
 0x23b   :  { %v241_v15 = vmul.f32 %v384_v13, %v240_v14 }
 0x23d   :  { %v242_v16 = vmul.f32 0.5, %v241_v15 }
 0x23f   :  { %v243_v17 = vsub.f32 1.5, %v242_v16 }
 0x241   :  { %v244_v18 = vmul.f32 %v384_v13, %v243_v17 }
 0x243   :  { %v248_v21 = vsel %vm247_vm12, %v384_v13, %v244_v18 }
 0x244   :  { %v249_v22 = vmul.f32 %v248_v21, %v237_v19 }
 0x246   :  { %v251_v24 = vmul.f32 %v250_v20, %v249_v22 }
 0x248   :  { %v253_v25 = vadd.f32 %v252_v23, %v251_v24 }
 0x24a   :  { %352 = vmatmul.msk.f32.vlgmr.msra.gmra.mxu2 %vm201_vm9, %v253_v25 }
 0x2cd   :  { %v275_v27 = vpop.f32.mrf.mxu2 }
 0x2ce   :  { %v276_v28 = vadd.f32 %v275_v27, %v254_v26 }
 0x2d0   :  { %v278_v29 = vmax.f32 %v276_v28, 0.0 }
 0x2d2   :  { %v279_v30 = vsel %vm201_vm9, %v278_v29, 0.0  ;;  %v282_v31 = vmul.f32 %v278_v29, %v278_v29 }
 0x2d3   :  { %280 = vadd.xlane.f32.xlu0 %v279_v30 }
 0x2d4   :  { %v283_v32 = vsel %vm201_vm9, %v282_v31, 0.0 }
 0x2d5   :  { %284 = vadd.xlane.f32.xlu2 %v283_v32 }
 0x346   :  { %v281_v37 = vpop.xlane.xlu0 %280 }
 0x347   :  { %v286_v38 = vmul.f32 0.03125, %v281_v37 }
 0x348   :  { %v285_v39 = vpop.xlane.xlu2 %284 }
 0x349   :  { %v288_v40 = vmul.f32 %v286_v38, %v286_v38  ;;  %v287_v41 = vmul.f32 0.03125, %v285_v39  ;;  %v290_v50 = vsub.f32 %v278_v29, %v286_v38 }
 0x34b   :  { %v289_v42 = vsub.f32 %v287_v41, %v288_v40 }
 0x34d   :  { %v291_v43 = vadd.f32 1e-05, %v289_v42 }
 0x34f   :  { %385 = vrsqrt.f32 %v291_v43  ;;  %vm298_vm14 = vweird.f32 %v291_v43 }
 0x355   :  { %v386_v44 = vpop.eup %385 }
 0x356   :  { %v293_v45 = vmul.f32 %v386_v44, %v291_v43  ;;  %vm299_vm13 = vweird.f32 %v386_v44 }
 0x357   :  { %vm300_vm15 = vmor %vm298_vm14, %vm299_vm13 }
 0x358   :  { %v294_v46 = vmul.f32 %v386_v44, %v293_v45 }
 0x35a   :  { %v295_v47 = vmul.f32 0.5, %v294_v46 }
 0x35c   :  { %v296_v48 = vsub.f32 1.5, %v295_v47 }
 0x35e   :  { %v297_v49 = vmul.f32 %v386_v44, %v296_v48 }
 0x360   :  { %v301_v52 = vsel %vm300_vm15, %v386_v44, %v297_v49 }
 0x361   :  { %v302_v53 = vmul.f32 %v301_v52, %v290_v50 }
 0x363   :  { %v304_v55 = vmul.f32 %v303_v51, %v302_v53 }
 0x365   :  { %v306_v56 = vadd.f32 %v305_v54, %v304_v55 }
 0x367   :  { %353 = vmatmul.msk.f32.vlgmr.msra.gmra.mxu3 %vm201_vm9, %v306_v56 }
 0x3ea   :  { %v328_v59 = vpop.f32.mrf.mxu3 }
 0x3eb   :  { %v329_v60 = vadd.f32 %v328_v59, %v307_v57 }
 0x3ed   :  { %331 = vst [vmem:[#allocation8] sm:$0xff] %v329_v60 }
 0x3ee   :  { %342 = dma.vmem_to_hbm [thread:$0]  %s338_s22, 128, %s340_s25, [#allocation4]  }
 0x3ef   :  { %487 = dma.done.wait [#allocation4], 128  }
 0x3f0   :  { %488 = vsyncadd [#allocation4], 4294967168 }
 0x3f1   :  { %347 = vsyncpa [#allocation3], 1 }
 0x3f2   :  { %348 = vsyncpa [#allocation6], 1 }
 0x3f3   :  { %349 = vsyncpa [#allocation4], 1 }

</bundles_post_ra>
